<compile_context>
chip_gen: v7x
topology: tpu7x:2x2x1
jax: 0.10.0
libtpu: 0.0.40
codegen_flags: <defaults>
</compile_context>

<pallas_src>
import functools

import jax
import jax.numpy as jnp
from jax import lax
from jax.experimental import pallas as pl
from jax.experimental.pallas import tpu as pltpu


def _round_up(x, m):
    return (x + m - 1) // m * m


def _vmem_limit(need_bytes):
    # Budget computed from actual buffer sizes + headroom; kept <= 48 MiB so it
    # is safe on v7x (64 MiB/TC) as well as v5e/v6e (128 MiB).
    return int(min(max(need_bytes + (8 << 20), 32 << 20), 48 << 20))


# ----------------------------------------------------------------------------
# Fused fast path: one kernel does gather+mean (via MXU one-hot counts),
# linear and log_softmax.  Table / W^T / bias are VMEM-resident.
# ----------------------------------------------------------------------------
def fused_cbow_kernel(idx_ref,    # VMEM (TB, C)        int32
                      emb_ref,    # VMEM (V_pad, E_pad) bf16   (resident)
                      wt_ref,     # VMEM (E_pad, V_pad) bf16   (resident)
                      b_ref,      # VMEM (1, V_pad)     f32    (resident)
                      out_ref,    # VMEM (TB, V_pad)    f32
                      *, inv_context):
    TB = idx_ref.shape[0]
    C = idx_ref.shape[1]
    Vr = emb_ref.shape[0]

    word_ids = lax.broadcasted_iota(jnp.int32, (1, Vr), 1)        # (1, Vr)

    # counts[i, v] = number of occurrences of word v in context row i (exact
    # small integers -> exact in bf16).  Loop over C keeps temps at (TB, Vr).
    counts = jnp.zeros((TB, Vr), jnp.float32)
    for c in range(C):                                            # C is small
        counts = counts + (idx_ref[:, c:c + 1] == word_ids).astype(jnp.float32)

    # Sum of context embeddings on the MXU, 1/C scale applied in f32.
    avg = jnp.dot(counts.astype(jnp.bfloat16), emb_ref[...],
                  preferred_element_type=jnp.float32) * inv_context   # (TB, E_pad)

    # Linear layer + bias (padded vocab columns carry a very negative bias).
    logits = jnp.dot(avg.astype(jnp.bfloat16), wt_ref[...],
                     preferred_element_type=jnp.float32) + b_ref[...]  # (TB, V_pad)

    # log_softmax over the padded vocab axis in one pass.
    m = jnp.max(logits, axis=-1, keepdims=True)
    l = jnp.sum(jnp.exp(logits - m), axis=-1, keepdims=True)
    out_ref[...] = logits - (m + jnp.log(l))


def _fused_forward(idx_pad, emb_pad, wt_pad, bias_pad, *, TB, nbt, C, V_pad,
                   E_pad, vmem_limit):
    kernel = functools.partial(fused_cbow_kernel, inv_context=1.0 / C)
    return pl.pallas_call(
        kernel,
        out_shape=jax.ShapeDtypeStruct((nbt * TB, V_pad), jnp.float32),
        grid_spec=pltpu.PrefetchScalarGridSpec(
            num_scalar_prefetch=0,
            grid=(nbt,),
            in_specs=[pl.BlockSpec((TB, C), lambda i: (i, 0)),
                      pl.BlockSpec((V_pad, E_pad), lambda i: (0, 0)),   # resident
                      pl.BlockSpec((E_pad, V_pad), lambda i: (0, 0)),   # resident
                      pl.BlockSpec((1, V_pad), lambda i: (0, 0))],      # resident
            out_specs=pl.BlockSpec((TB, V_pad), lambda i: (i, 0))),
        compiler_params=pltpu.CompilerParams(
            dimension_semantics=("parallel",),
            vmem_limit_bytes=vmem_limit),
    )(idx_pad, emb_pad, wt_pad, bias_pad)


# ----------------------------------------------------------------------------
# Streamed general path, Kernel A: masked, group-pipelined embedding gather.
# ----------------------------------------------------------------------------
def gather_mean_stream_kernel(idx_ref,    # SMEM (B_pad*C,) int32 [prefetch]
                              nb_ref,     # SMEM (1,)       int32 [prefetch]
                              emb_ref,    # ANY  (V_pad, E_pad) bf16 (HBM)
                              avg_ref,    # VMEM (TB, E_pad) bf16 output block
                              rows_buf,   # VMEM (2, G, C, E_pad) bf16
                              sem,        # DMA sems (2, G)
                              *, group, context):
    TB = avg_ref.shape[0]
    G = group
    C = context
    NG = TB // G
    b0 = pl.program_id(0) * TB
    n_real = nb_ref[0]
    inv_c = 1.0 / C

    def row_copies(b_local, slot, r):
        # All C copies of one batch row share one semaphore (equal sizes); we
        # always issue exactly C waits before touching the data.
        cps = []
        for c in range(C):
            word = idx_ref[(b0 + b_local) * C + c]
            cps.append(pltpu.make_async_copy(emb_ref.at[word],
                                             rows_buf.at[slot, r, c],
                                             sem.at[slot, r]))
        return cps

    def start_group(g, slot):
        for r in range(G):
            b_local = g * G + r

            @pl.when(b0 + b_local < n_real)        # skip DMAs for padded rows
            def _(b_local=b_local, r=r):
                for cp in row_copies(b_local, slot, r):
                    cp.start()

    def wait_group(g, slot):
        for r in range(G):
            b_local = g * G + r

            @pl.when(b0 + b_local < n_real)
            def _(b_local=b_local, r=r):
                for cp in row_copies(b_local, slot, r):
                    cp.wait()

    start_group(0, 0)

    @pl.loop(0, NG)
    def _(g):
        slot = g % 2
        wait_group(g, slot)

        @pl.when(g + 1 < NG)
        def _():
            start_group(g + 1, 1 - slot)

        row_in_tile = g * G + lax.broadcasted_iota(jnp.int32, (G, 1), 0)
        valid = (b0 + row_in_tile) < n_real                        # (G, 1)
        rows = rows_buf[slot].astype(jnp.float32)                  # (G, C, E_pad)
        means = jnp.sum(rows, axis=1) * inv_c                      # (G, E_pad)
        means = jnp.where(valid, means, 0.0)                       # zero padded rows
        off = pl.multiple_of(g * G, G)
        avg_ref[pl.ds(off, G), :] = means.astype(avg_ref.dtype)    # dense 8-row store


# ----------------------------------------------------------------------------
# Streamed general path, Kernel B pass 1: per-row LSE (online max / sum-exp).
# Output tiles are never touched in this pass; only (B_pad, 1) is written.
# ----------------------------------------------------------------------------
def lse_kernel(x_ref, wt_ref, b_ref, lse_ref, m_ref, l_ref):
    v = pl.program_id(1)

    @pl.when(v == 0)
    def _():
        m_ref[...] = jnp.full_like(m_ref, -jnp.inf)
        l_ref[...] = jnp.zeros_like(l_ref)

    logits = jnp.dot(x_ref[...], wt_ref[...],
                     preferred_element_type=jnp.float32) + b_ref[...]
    m_prev = m_ref[...]
    m_new = jnp.maximum(m_prev, jnp.max(logits, axis=-1, keepdims=True))
    l_ref[...] = (l_ref[...] * jnp.exp(m_prev - m_new)
                  + jnp.sum(jnp.exp(logits - m_new), axis=-1, keepdims=True))
    m_ref[...] = m_new

    @pl.when(v == pl.num_programs(1) - 1)
    def _():
        lse_ref[...] = m_ref[...] + jnp.log(l_ref[...])


# ----------------------------------------------------------------------------
# Streamed general path, Kernel B pass 2: recompute logits, write output once.
# ----------------------------------------------------------------------------
def logprob_kernel(x_ref, wt_ref, b_ref, lse_ref, out_ref):
    logits = jnp.dot(x_ref[...], wt_ref[...],
                     preferred_element_type=jnp.float32) + b_ref[...]
    out_ref[...] = logits - lse_ref[...]


def _streamed_forward(idx_pad, emb_pad, wt_pad, bias_pad, *, B, TB, nbt, nvt,
                      TV, C, E_pad, V_pad, B_pad):
    GROUP = 8
    idx_flat = idx_pad.reshape(-1)
    n_real = jnp.array([B], jnp.int32)

    gather_kernel = functools.partial(gather_mean_stream_kernel,
                                      group=GROUP, context=C)
    avg = pl.pallas_call(
        gather_kernel,
        out_shape=jax.ShapeDtypeStruct((B_pad, E_pad), jnp.bfloat16),
        grid_spec=pltpu.PrefetchScalarGridSpec(
            num_scalar_prefetch=2,
            grid=(nbt,),
            in_specs=[pl.BlockSpec(memory_space=pl.ANY)],     # table stays in HBM
            out_specs=pl.BlockSpec((TB, E_pad), lambda i, idx, nb: (i, 0)),
            scratch_shapes=[pltpu.VMEM((2, GROUP, C, E_pad), jnp.bfloat16),
                            pltpu.SemaphoreType.DMA((2, GROUP))]),
        compiler_params=pltpu.CompilerParams(
            dimension_semantics=("parallel",)),
    )(idx_flat, n_real, emb_pad)

    kb_need = (2 * TB * E_pad * 2 + 2 * E_pad * TV * 2 + 2 * TV * 4
               + 2 * TB * TV * 4 + 4 * TB * 4 + 4 * TB * TV * 4)
    kb_limit = _vmem_limit(kb_need)

    lse = pl.pallas_call(
        lse_kernel,
        out_shape=jax.ShapeDtypeStruct((B_pad, 1), jnp.float32),
        grid_spec=pltpu.PrefetchScalarGridSpec(
            num_scalar_prefetch=0,
            grid=(nbt, nvt),
            in_specs=[pl.BlockSpec((TB, E_pad), lambda b, v: (b, 0)),
                      pl.BlockSpec((E_pad, TV), lambda b, v: (0, v)),
                      pl.BlockSpec((1, TV), lambda b, v: (0, v))],
            out_specs=pl.BlockSpec((TB, 1), lambda b, v: (b, 0)),
            scratch_shapes=[pltpu.VMEM((TB, 1), jnp.float32),
                            pltpu.VMEM((TB, 1), jnp.float32)]),
        compiler_params=pltpu.CompilerParams(
            dimension_semantics=("parallel", "arbitrary"),
            vmem_limit_bytes=kb_limit),
    )(avg, wt_pad, bias_pad)

    out_pad = pl.pallas_call(
        logprob_kernel,
        out_shape=jax.ShapeDtypeStruct((B_pad, V_pad), jnp.float32),
        grid_spec=pltpu.PrefetchScalarGridSpec(
            num_scalar_prefetch=0,
            grid=(nbt, nvt),
            in_specs=[pl.BlockSpec((TB, E_pad), lambda b, v: (b, 0)),
                      pl.BlockSpec((E_pad, TV), lambda b, v: (0, v)),
                      pl.BlockSpec((1, TV), lambda b, v: (0, v)),
                      pl.BlockSpec((TB, 1), lambda b, v: (b, 0))],
            out_specs=pl.BlockSpec((TB, TV), lambda b, v: (b, v))),
        compiler_params=pltpu.CompilerParams(
            dimension_semantics=("parallel", "parallel"),
            vmem_limit_bytes=kb_limit),
    )(avg, wt_pad, bias_pad, lse)
    return out_pad


# ----------------------------------------------------------------------------
# Wrappers
# ----------------------------------------------------------------------------
def prepare_cbow_params(emb_table, linear_w, linear_b, *, tile_v=512):
    """One-time weight preprocessing (padding / transpose / bf16 cast).

    Hoisted out of the per-call path so repeated forward calls do not pay for
    it (perf review item).
    """
    V, E = emb_table.shape
    E_pad = _round_up(E, 128)
    TV = min(tile_v, _round_up(V, 128))
    V_pad = _round_up(V, TV)
    NEG = -1e30

    emb_pad = jnp.zeros((V_pad, E_pad), jnp.bfloat16)
    emb_pad = emb_pad.at[:V, :E].set(emb_table.astype(jnp.bfloat16))

    wt_pad = jnp.zeros((E_pad, V_pad), jnp.bfloat16)
    wt_pad = wt_pad.at[:E, :V].set(linear_w.T.astype(jnp.bfloat16))

    bias_pad = jnp.full((1, V_pad), NEG, jnp.float32)      # padded vocab cols
    bias_pad = bias_pad.at[0, :V].set(linear_b.astype(jnp.float32))

    return dict(emb=emb_pad, wt=wt_pad, bias=bias_pad,
                V=V, E=E, E_pad=E_pad, V_pad=V_pad, TV=TV)


def cbow_forward_prepared(indices, params, *, force_streaming=False,
                          fused_vmem_budget=24 * 1024 * 1024):
    B, C = indices.shape
    V = params["V"]
    E_pad, V_pad, TV = params["E_pad"], params["V_pad"], params["TV"]
    emb_pad, wt_pad, bias_pad = params["emb"], params["wt"], params["bias"]

    # Batch tiling: pad to a multiple of 8 only (avoid computing/writing 128
    # rows of garbage for tiny batches); keep >= 2 tiles for moderate batches
    # so megacore 'parallel' sharding can engage, 256-row tiles for big ones.
    B_pad8 = _round_up(B, 8)
    if B_pad8 <= 128:
        TB = B_pad8
    elif B_pad8 < 1024:
        TB = 128
    else:
        TB = 256
    B_pad = _round_up(B, TB)
    nbt = B_pad // TB
    nvt = V_pad // TV

    idx_pad = jnp.zeros((B_pad, C), jnp.int32)
    idx_pad = idx_pad.at[:B].set(indices.astype(jnp.int32))

    # VMEM needed by the fully fused path (resident table + W^T + temps).
    fused_need = (2 * TB * C * 4
                  + 2 * V_pad * E_pad * 2        # embedding table (x2 safety)
                  + 2 * E_pad * V_pad * 2        # W^T
                  + 2 * V_pad * 4                # bias
                  + 2 * TB * V_pad * 4           # output tiles
                  + 3 * TB * V_pad * 4           # one-hot count temporaries
                  + 3 * TB * V_pad * 4           # logits / softmax temporaries
                  + TB * E_pad * 4)              # avg embedding
    use_fused = (not force_streaming) and fused_need <= fused_vmem_budget

    if use_fused:
        out_pad = _fused_forward(idx_pad, emb_pad, wt_pad, bias_pad,
                                 TB=TB, nbt=nbt, C=C, V_pad=V_pad, E_pad=E_pad,
                                 vmem_limit=_vmem_limit(fused_need))
    else:
        out_pad = _streamed_forward(idx_pad, emb_pad, wt_pad, bias_pad,
                                    B=B, TB=TB, nbt=nbt, nvt=nvt, TV=TV,
                                    C=C, E_pad=E_pad, V_pad=V_pad, B_pad=B_pad)
    return out_pad[:B, :V]


def cbow_forward(indices, emb_table, linear_w, linear_b, **kwargs):
    params = prepare_cbow_params(emb_table, linear_w, linear_b)
    return cbow_forward_prepared(indices, params, **kwargs)


if __name__ == "__main__":
    vocab_size = 384        # not a multiple of the V tile -> exercises padding
    embedding_size = 48
    context_size = 5
    batch = 20

    key = jax.random.PRNGKey(0)
    k_idx, k_emb, k_w, k_b = jax.random.split(key, 4)

    indices = jax.random.randint(k_idx, (batch, context_size), 0, vocab_size,
                                 dtype=jnp.int32)
    emb_table = jax.random.normal(k_emb, (vocab_size, embedding_size),
                                  dtype=jnp.float32)
    linear_w = jax.random.normal(k_w, (vocab_size, embedding_size),
                                 dtype=jnp.float32) * 0.1
    linear_b = jax.random.normal(k_b, (vocab_size,), dtype=jnp.float32) * 0.1

    params = prepare_cbow_params(emb_table, linear_w, linear_b)

    # Fast path: fully fused single kernel (table + W^T resident in VMEM).
    log_probs = cbow_forward_prepared(indices, params)
    jax.block_until_ready(log_probs)

    # General path (forced): streamed HBM gather + two-pass log_softmax.
    log_probs_stream = cbow_forward_prepared(indices, params,
                                             force_streaming=True)
    jax.block_until_ready(log_probs_stream)

    # Pure-JAX f32 reference (gather + mean + linear + log_softmax).
    ref_avg = jnp.mean(emb_table[indices], axis=1)
    ref_logits = ref_avg @ linear_w.T + linear_b
    ref = jax.nn.log_softmax(ref_logits, axis=-1)

    assert log_probs.shape == (batch, vocab_size)
    assert log_probs_stream.shape == (batch, vocab_size)
    err_fused = float(jnp.max(jnp.abs(log_probs - ref)))
    err_stream = float(jnp.max(jnp.abs(log_probs_stream - ref)))
    # bf16 weight/activation path -> loose-ish tolerance vs f32 reference.
    assert jnp.allclose(log_probs, ref, atol=2e-2, rtol=2e-2), \
        f"fused mismatch, max err {err_fused}"
    assert jnp.allclose(log_probs_stream, ref, atol=2e-2, rtol=2e-2), \
        f"streamed mismatch, max err {err_stream}"

    print("KERNEL_OK")
</pallas_src>

<mosaic_0001>
module attributes {stable_mosaic.version = 11 : i64} {
  func.func @fused_cbow_kernel(%arg0: i32, %arg1: memref<24x5xi32, #tpu.memory_space<vmem>>, %arg2: memref<384x128xbf16, #tpu.memory_space<vmem>>, %arg3: memref<128x384xbf16, #tpu.memory_space<vmem>>, %arg4: memref<1x384xf32, #tpu.memory_space<vmem>>, %arg5: memref<24x384xf32, #tpu.memory_space<vmem>>) attributes {dimension_semantics = [#tpu.dimension_semantics<parallel>], iteration_bounds = array<i64: 1>, scalar_prefetch = 0 : i64, scratch_operands = 0 : i64, tpu.core_type = #tpu.core_type<tc>, window_params = [{transform_indices = @transform_0, window_bounds = array<i64: 24, 5>}, {pipeline_mode = #tpu.pipeline_mode<synchronous>, transform_indices = @transform_1, window_bounds = array<i64: 384, 128>}, {pipeline_mode = #tpu.pipeline_mode<synchronous>, transform_indices = @transform_2, window_bounds = array<i64: 128, 384>}, {pipeline_mode = #tpu.pipeline_mode<synchronous>, transform_indices = @transform_3, window_bounds = array<i64: 1, 384>}, {transform_indices = @transform_4, window_bounds = array<i64: 24, 384>}]} {
    %0 = tpu.iota {dimensions = array<i32: 1>} : vector<1x384xi32>
    %cst = arith.constant 0.000000e+00 : f32
    %1 = vector.broadcast %cst : f32 to vector<24x384xf32>
    %c0 = arith.constant 0 : index
    %c0_0 = arith.constant 0 : index
    %2 = vector.load %arg1[%c0, %c0_0] : memref<24x5xi32, #tpu.memory_space<vmem>>, vector<24x1xi32>
    %3 = vector.broadcast %2 : vector<24x1xi32> to vector<24x384xi32>
    %4 = vector.broadcast %0 : vector<1x384xi32> to vector<24x384xi32>
    %5 = arith.cmpi eq, %3, %4 : vector<24x384xi32>
    %6 = arith.extui %5 : vector<24x384xi1> to vector<24x384xi32>
    %7 = arith.sitofp %6 : vector<24x384xi32> to vector<24x384xf32>
    %8 = arith.addf %1, %7 : vector<24x384xf32>
    %c0_1 = arith.constant 0 : index
    %c1 = arith.constant 1 : index
    %9 = vector.load %arg1[%c0_1, %c1] : memref<24x5xi32, #tpu.memory_space<vmem>>, vector<24x1xi32>
    %10 = vector.broadcast %9 : vector<24x1xi32> to vector<24x384xi32>
    %11 = vector.broadcast %0 : vector<1x384xi32> to vector<24x384xi32>
    %12 = arith.cmpi eq, %10, %11 : vector<24x384xi32>
    %13 = arith.extui %12 : vector<24x384xi1> to vector<24x384xi32>
    %14 = arith.sitofp %13 : vector<24x384xi32> to vector<24x384xf32>
    %15 = arith.addf %8, %14 : vector<24x384xf32>
    %c0_2 = arith.constant 0 : index
    %c2 = arith.constant 2 : index
    %16 = vector.load %arg1[%c0_2, %c2] : memref<24x5xi32, #tpu.memory_space<vmem>>, vector<24x1xi32>
    %17 = vector.broadcast %16 : vector<24x1xi32> to vector<24x384xi32>
    %18 = vector.broadcast %0 : vector<1x384xi32> to vector<24x384xi32>
    %19 = arith.cmpi eq, %17, %18 : vector<24x384xi32>
    %20 = arith.extui %19 : vector<24x384xi1> to vector<24x384xi32>
    %21 = arith.sitofp %20 : vector<24x384xi32> to vector<24x384xf32>
    %22 = arith.addf %15, %21 : vector<24x384xf32>
    %c0_3 = arith.constant 0 : index
    %c3 = arith.constant 3 : index
    %23 = vector.load %arg1[%c0_3, %c3] : memref<24x5xi32, #tpu.memory_space<vmem>>, vector<24x1xi32>
    %24 = vector.broadcast %23 : vector<24x1xi32> to vector<24x384xi32>
    %25 = vector.broadcast %0 : vector<1x384xi32> to vector<24x384xi32>
    %26 = arith.cmpi eq, %24, %25 : vector<24x384xi32>
    %27 = arith.extui %26 : vector<24x384xi1> to vector<24x384xi32>
    %28 = arith.sitofp %27 : vector<24x384xi32> to vector<24x384xf32>
    %29 = arith.addf %22, %28 : vector<24x384xf32>
    %c0_4 = arith.constant 0 : index
    %c4 = arith.constant 4 : index
    %30 = vector.load %arg1[%c0_4, %c4] : memref<24x5xi32, #tpu.memory_space<vmem>>, vector<24x1xi32>
    %31 = vector.broadcast %30 : vector<24x1xi32> to vector<24x384xi32>
    %32 = vector.broadcast %0 : vector<1x384xi32> to vector<24x384xi32>
    %33 = arith.cmpi eq, %31, %32 : vector<24x384xi32>
    %34 = arith.extui %33 : vector<24x384xi1> to vector<24x384xi32>
    %35 = arith.sitofp %34 : vector<24x384xi32> to vector<24x384xf32>
    %36 = arith.addf %29, %35 : vector<24x384xf32>
    %37 = arith.truncf %36 : vector<24x384xf32> to vector<24x384xbf16>
    %c0_5 = arith.constant 0 : index
    %c0_6 = arith.constant 0 : index
    %38 = vector.load %arg2[%c0_5, %c0_6] : memref<384x128xbf16, #tpu.memory_space<vmem>>, vector<384x128xbf16>
    %cst_7 = arith.constant dense<0.000000e+00> : vector<24x128xf32>
    %39 = tpu.matmul %37, %38, %cst_7 {dimension_numbers = #tpu.dot_dimension_numbers<[1], [0], [0], [1], [0, 0, 1, 1], [], []>} : vector<24x384xbf16>, vector<384x128xbf16>, vector<24x128xf32> -> vector<24x128xf32>
    %cst_8 = arith.constant 2.000000e-01 : f32
    %40 = vector.broadcast %cst_8 : f32 to vector<24x128xf32>
    %41 = arith.mulf %39, %40 : vector<24x128xf32>
    %42 = arith.truncf %41 : vector<24x128xf32> to vector<24x128xbf16>
    %c0_9 = arith.constant 0 : index
    %c0_10 = arith.constant 0 : index
    %43 = vector.load %arg3[%c0_9, %c0_10] : memref<128x384xbf16, #tpu.memory_space<vmem>>, vector<128x384xbf16>
    %cst_11 = arith.constant dense<0.000000e+00> : vector<24x384xf32>
    %44 = tpu.matmul %42, %43, %cst_11 {dimension_numbers = #tpu.dot_dimension_numbers<[1], [0], [0], [1], [0, 0, 1, 1], [], []>} : vector<24x128xbf16>, vector<128x384xbf16>, vector<24x384xf32> -> vector<24x384xf32>
    %c0_12 = arith.constant 0 : index
    %c0_13 = arith.constant 0 : index
    %45 = vector.load %arg4[%c0_12, %c0_13] : memref<1x384xf32, #tpu.memory_space<vmem>>, vector<1x384xf32>
    %46 = vector.broadcast %45 : vector<1x384xf32> to vector<24x384xf32>
    %47 = arith.addf %44, %46 : vector<24x384xf32>
    %cst_14 = arith.constant dense<0xFF800000> : vector<24xf32>
    %48 = vector.multi_reduction <maximumf>, %47, %cst_14 [1] : vector<24x384xf32> to vector<24xf32>
    %49 = vector.shape_cast %48 : vector<24xf32> to vector<24x1xf32>
    %50 = vector.broadcast %49 : vector<24x1xf32> to vector<24x384xf32>
    %51 = arith.subf %47, %50 : vector<24x384xf32>
    %52 = math.exp %51 : vector<24x384xf32>
    %cst_15 = arith.constant dense<0.000000e+00> : vector<24xf32>
    %53 = vector.multi_reduction <add>, %52, %cst_15 [1] : vector<24x384xf32> to vector<24xf32>
    %54 = vector.shape_cast %53 : vector<24xf32> to vector<24x1xf32>
    %55 = math.log %54 : vector<24x1xf32>
    %56 = arith.addf %49, %55 : vector<24x1xf32>
    %57 = vector.broadcast %56 : vector<24x1xf32> to vector<24x384xf32>
    %58 = arith.subf %47, %57 : vector<24x384xf32>
    %c0_16 = arith.constant 0 : index
    %c0_17 = arith.constant 0 : index
    %59 = vector.load %arg5[%c0_16, %c0_17] : memref<24x384xf32, #tpu.memory_space<vmem>>, vector<24x384xf32>
    tpu.vector_store %arg5[%c0_16, %c0_17], %58 {strides = array<i32>} : memref<24x384xf32, #tpu.memory_space<vmem>>, vector<24x384xf32>,
    return
  }
  func.func @transform_0(%arg0: i32) -> (i32, i32) {
    %c0_i32 = arith.constant 0 : i32
    %c0_i32_0 = arith.constant 0 : i32
    return %arg0, %c0_i32 : i32, i32
  }
  func.func @transform_1(%arg0: i32) -> (i32, i32) {
    %c0_i32 = arith.constant 0 : i32
    %c0_i32_0 = arith.constant 0 : i32
    %c0_i32_1 = arith.constant 0 : i32
    return %c0_i32, %c0_i32_0 : i32, i32
  }
  func.func @transform_2(%arg0: i32) -> (i32, i32) {
    %c0_i32 = arith.constant 0 : i32
    %c0_i32_0 = arith.constant 0 : i32
    %c0_i32_1 = arith.constant 0 : i32
    return %c0_i32, %c0_i32_0 : i32, i32
  }
  func.func @transform_3(%arg0: i32) -> (i32, i32) {
    %c0_i32 = arith.constant 0 : i32
    %c0_i32_0 = arith.constant 0 : i32
    %c0_i32_1 = arith.constant 0 : i32
    return %c0_i32, %c0_i32_0 : i32, i32
  }
  func.func @transform_4(%arg0: i32) -> (i32, i32) {
    %c0_i32 = arith.constant 0 : i32
    %c0_i32_0 = arith.constant 0 : i32
    return %arg0, %c0_i32 : i32, i32
  }
}

</mosaic_0001>

<bundles_post_ra>
// kernel: tpu_custom_call.1
= control target key start
LH: loop header
LB: loop body
LE: loop exit
PB: predicated region body
PF: predicated region fallthrough
CT: control target
= control target key end

     0   :  { %9 = vsyncpa [#allocation3], 0  ;;  %s1568_s0 = inlined_call_operand.vmem [shape: s32[24,5], index: 0, kind: input, shape index: {}]   ;;  %s1569_s1 = inlined_call_operand.hbm [shape: bf16[384,128], index: 1, kind: input, shape index: {}]   ;;  %s1570_s2 = inlined_call_operand.hbm [shape: bf16[128,384], index: 2, kind: input, shape index: {}]   ;;  %s1571_s3 = inlined_call_operand.vmem [shape: f32[1,384], index: 3, kind: input, shape index: {}]   ;;  %s1572_s4 = inlined_call_operand.hbm [shape: f32[24,384], index: 4, kind: output, shape index: {}]  }
   0x1   :  { %10 = vsyncpa [#allocation6], 0 }
   0x2   :  { %11 = vsyncpa [#allocation4], 0  ;;  %s1308_s15 = smov [#allocation2]   ;;  %s1236_s19 = scalar_lea.hbm %s1569_s1, 3072 }
   0x3   :  { %s19_s16 = sshll.u32 %s1308_s15, 4  ;;  %p1237_p0 = scmp.ne.s32.totalorder %s1569_s1, %s1236_s19  ;;  %s20_s16 = int_to_ptr.vmem [resolvable:$true] %s19_s16 }
   0x4   :  { %p1240_p1 = scmp.lt.u32.totalorder %s1236_s19, %s1569_s1 }
   0x6   :  { %p1242_p2 = pnand %p1240_p1, %p1237_p0 }
   0x8   :  { %1245 = shalt.err (!%p1242_p2)
}
   0x9   :  { %s1246_s24 = scalar_lea.vmem %s20_s16, 3072  ;;  %p1251_p4 = scmp.lt.s32.totalorder %s20_s16, %s20_s16 }
   0xa   :  { %p1247_p3 = scmp.ne.s32.totalorder %s20_s16, %s1246_s24  ;;  %p1252_p5 = scmp.lt.s32.totalorder %s1246_s24, %s1246_s24 }
   0xc   :  { %p1253_p6 = por %p1252_p5, %p1251_p4 }
   0xe   :  { %p1254_p7 = pnand %p1253_p6, %p1247_p3 }
  0x10   :  { %1257 = shalt.err (!%p1254_p7)
}
  0x11   :  { %s1309_s25 = smov 64   ;;  %s1310_s26 = smov 4  }
  0x12   :  { %25 = dma.hbm_to_vmem [thread:$0]  %s1569_s1, 3072, %s20_s16, [#allocation3], %s1309_s25, %s1309_s25, %s1310_s26  }
  0x13   :  { %s1311_s29 = smov [#allocation5]   ;;  %s1258_s7 = scalar_lea.hbm %s1570_s2, 3072 }
  0x14   :  { %s31_s30 = sshll.u32 %s1311_s29, 4  ;;  %p1259_p8 = scmp.ne.s32.totalorder %s1570_s2, %s1258_s7  ;;  %s32_s30 = int_to_ptr.vmem [resolvable:$true] %s31_s30 }
  0x15   :  { %p1262_p9 = scmp.lt.u32.totalorder %s1258_s7, %s1570_s2 }
  0x17   :  { %p1264_p10 = pnand %p1262_p9, %p1259_p8 }
  0x19   :  { %1267 = shalt.err (!%p1264_p10)
}
  0x1a   :  { %s1268_s12 = scalar_lea.vmem %s32_s30, 3072  ;;  %p1273_p12 = scmp.lt.s32.totalorder %s32_s30, %s32_s30 }
  0x1b   :  { %p1269_p11 = scmp.ne.s32.totalorder %s32_s30, %s1268_s12  ;;  %p1274_p13 = scmp.lt.s32.totalorder %s1268_s12, %s1268_s12 }
  0x1d   :  { %p1275_p0 = por %p1274_p13, %p1273_p12 }
  0x1f   :  { %p1276_p1 = pnand %p1275_p0, %p1269_p11 }
  0x21   :  { %1279 = shalt.err (!%p1276_p1)
}
  0x22   :  { %s1312_s1 = smov 192   ;;  %s1313_s13 = smov 12  }
  0x23   :  { %37 = dma.hbm_to_vmem [thread:$0]  %s1570_s2, 3072, %s32_s30, [#allocation6], %s1312_s1, %s1312_s1, %s1313_s13  }
  0x24   :  { %1302 = dma.done.wait [#allocation3], 3072  }
  0x25   :  { %1303 = vsyncadd [#allocation3], 4294964224 }
  0x26   :  { %1304 = dma.done.wait [#allocation6], 3072  }
  0x27   :  { %1305 = vsyncadd [#allocation6], 4294964224  ;;  %v1314_v0 = vmov 1   ;;  %v1315_v1 = vmov 0   ;;  %v51_v2 = vld [vmem:[%s1568_s0] sm:$0xff]  ;;  %v1379_v3 = vld [vmem:[%s1568_s0 + $0x8] sm:$0xff]  ;;  %v47_v34 = vlaneseq }
  0x28   :  { %1147 = vset.pattern.permute.xlu1 %v1314_v0  ;;  %1146 = vset.pattern.permute.xlu0 %v1315_v1  ;;  %v1386_v4 = vld [vmem:[%s1568_s0 + $0x10] sm:$0xff]  ;;  %v1156_v5 = vld [vmem:[#allocation2 + $0x40] sm:$0xff]   ;;  %v1316_v6 = vmov 2   ;;  %v1159_v9 = vld [vmem:[#allocation2 + $0x48] sm:$0xff]   ;;  %v1317_v14 = vmov 3   ;;  %v1318_v22 = vmov 4  }
  0x29   :  { %100 = vperm.xlu1 %1147, %v51_v2   ;;  %55 = vperm.xlu0 %1146, %v51_v2   ;;  %v1157_v7 = vld [vmem:[#allocation2] sm:$0xff]   ;;  %v1160_v10 = vld [vmem:[#allocation2 + $0x8] sm:$0xff]   ;;  %v1162_v12 = vld [vmem:[#allocation2 + $0x50] sm:$0xff]   ;;  %v1401_v35 = vand.u32 127, %v47_v34  ;;  %v1319_v44 = vmov 0.0  }
  0x2a   :  { %1043 = vmatprep.subr.bf16.mxu0 %v1156_v5  ;;  %v1158_v8 = vld [vmem:[#allocation2 + $0x80] sm:$0xff]   ;;  %v1161_v11 = vld [vmem:[#allocation2 + $0x88] sm:$0xff]   ;;  %v1163_v13 = vld [vmem:[#allocation2 + $0x10] sm:$0xff]  }
  0x2b   :  { %1044 = vmatpush3.bf16.msra.mxu0 %v1157_v7  ;;  %1091 = vmatprep.subr.bf16.mxu1 %v1158_v8  ;;  %v1164_v15 = vld [vmem:[#allocation2 + $0x90] sm:$0xff]   ;;  %v1165_v16 = vld [vmem:[#allocation2 + $0x58] sm:$0xff]   ;;  %v1168_v19 = vld [vmem:[#allocation2 + $0x60] sm:$0xff]   ;;  %v1404_v38 = vadd.s32 128, %v1401_v35  ;;  %v1407_v40 = vadd.s32 256, %v1401_v35 }
  0x2c   :  { %1045 = vmatprep.subr.bf16.mxu0 %v1159_v9  ;;  %1092 = vmatpush3.bf16.msra.mxu1 %v1158_v8  ;;  %v1166_v17 = vld [vmem:[#allocation2 + $0x18] sm:$0xff]   ;;  %v1169_v20 = vld [vmem:[#allocation2 + $0x20] sm:$0xff]   ;;  %v1171_v23 = vld [vmem:[#allocation2 + $0x68] sm:$0xff]  }
  0x2d   :  { %103 = vperm.xlu1 %1147, %v1379_v3   ;;  %58 = vperm.xlu0 %1146, %v1379_v3   ;;  %v1167_v18 = vld [vmem:[#allocation2 + $0x98] sm:$0xff]   ;;  %v1170_v21 = vld [vmem:[#allocation2 + $0xa0] sm:$0xff]   ;;  %v1172_v24 = vld [vmem:[#allocation2 + $0x28] sm:$0xff]  }
  0x2e   :  { %1093 = vmatprep.subr.bf16.mxu1 %v1161_v11  ;;  %v1173_v25 = vld [vmem:[#allocation2 + $0xa8] sm:$0xff]   ;;  %v1174_v26 = vld [vmem:[#allocation2 + $0x70] sm:$0xff]   ;;  %v1177_v29 = vld [vmem:[#allocation2 + $0x78] sm:$0xff]  }
  0x2f   :  { %1046 = vmatpush3.bf16.msra.mxu0 %v1160_v10  ;;  %v1175_v27 = vld [vmem:[#allocation2 + $0x30] sm:$0xff]   ;;  %v1178_v30 = vld [vmem:[#allocation2 + $0x38] sm:$0xff]  }
  0x30   :  { %1047 = vmatprep.subr.bf16.mxu0 %v1162_v12  ;;  %1094 = vmatpush3.bf16.msra.mxu1 %v1161_v11  ;;  %v1176_v28 = vld [vmem:[#allocation2 + $0xb0] sm:$0xff]   ;;  %v1179_v31 = vld [vmem:[#allocation2 + $0xb8] sm:$0xff]  }
  0x31   :  { %1148 = vset.pattern.permute.xlu1 %v1316_v6  ;;  %1150 = vset.pattern.permute.xlu0 %v1314_v0  ;;  %v1182_v32 = vld [vmem:[#allocation5 + $0x4] ss:$12 sps:$4 sm:$0xff]   ;;  %v1397_v33 = vld [vmem:[#allocation5 + $0x8] ss:$12 sps:$4 sm:$0xff]  }
  0x32   :  { %148 = vperm.xlu1 %1148, %v1379_v3   ;;  %106 = vperm.xlu0 %1150, %v1386_v4  }
  0x33   :  { %1048 = vmatpush3.bf16.msra.mxu0 %v1163_v13  ;;  %1095 = vmatprep.subr.bf16.mxu1 %v1164_v15 }
  0x34   :  { %1049 = vmatprep.subr.bf16.mxu0 %v1165_v16  ;;  %1096 = vmatpush3.bf16.msra.mxu1 %v1164_v15 }
  0x35   :  { %1097 = vmatprep.subr.bf16.mxu1 %v1167_v18 }
  0x36   :  { %1149 = vset.pattern.permute.xlu1 %v1315_v1  ;;  %1151 = vset.pattern.permute.xlu0 %v1316_v6 }
  0x37   :  { %61 = vperm.xlu1 %1149, %v1386_v4   ;;  %145 = vperm.xlu0 %1151, %v51_v2  }
  0x38   :  { %1050 = vmatpush3.bf16.msra.mxu0 %v1166_v17  ;;  %1098 = vmatpush3.bf16.msra.mxu1 %v1167_v18 }
  0x39   :  { %1051 = vmatprep.subr.bf16.mxu0 %v1168_v19  ;;  %1099 = vmatprep.subr.bf16.mxu1 %v1170_v21 }
  0x3b   :  { %1152 = vset.pattern.permute.xlu1 %v1317_v14  ;;  %151 = vperm.xlu0 %1151, %v1386_v4  }
  0x3c   :  { %190 = vperm.xlu1 %1152, %v51_v2   ;;  %1052 = vmatpush3.bf16.msra.mxu0 %v1169_v20 }
  0x3d   :  { %1053 = vmatprep.subr.bf16.mxu0 %v1171_v23  ;;  %1100 = vmatpush3.bf16.msra.mxu1 %v1170_v21 }
  0x3e   :  { %1101 = vmatprep.subr.bf16.mxu1 %v1173_v25 }
  0x3f   :  { %1154 = vset.pattern.permute.xlu0 %v1317_v14 }
  0x40   :  { %193 = vperm.xlu1 %1152, %v1379_v3   ;;  %196 = vperm.xlu0 %1154, %v1386_v4  }
  0x41   :  { %1054 = vmatpush3.bf16.msra.mxu0 %v1172_v24  ;;  %1102 = vmatpush3.bf16.msra.mxu1 %v1173_v25 }
  0x42   :  { %1055 = vmatprep.subr.bf16.mxu0 %v1174_v26  ;;  %1103 = vmatprep.subr.bf16.mxu1 %v1176_v28 }
  0x44   :  { %1153 = vset.pattern.permute.xlu1 %v1318_v22  ;;  %1155 = vset.pattern.permute.xlu0 %v1318_v22 }
  0x45   :  { %235 = vperm.xlu1 %1153, %v51_v2   ;;  %1056 = vmatpush3.bf16.msra.mxu0 %v1175_v27 }
  0x46   :  { %1057 = vmatprep.subr.bf16.mxu0 %v1177_v29  ;;  %1104 = vmatpush3.bf16.msra.mxu1 %v1176_v28 }
  0x47   :  { %1105 = vmatprep.subr.bf16.mxu1 %v1179_v31 }
  0x49   :  { %238 = vperm.xlu1 %1153, %v1379_v3   ;;  %1058 = vmatpush3.bf16.msra.mxu0 %v1178_v30 }
  0x4a   :  { %1106 = vmatpush3.bf16.msra.mxu1 %v1179_v31  ;;  %755 = vmatprep.subr.bf16.mxu0 %v1182_v32 }
  0x4b   :  { %1111 = vmatprep.subr.bf16.mxu1 %v1397_v33 }
  0x4d   :  { %241 = vperm.xlu1 %1153, %v1386_v4  }
  0xa8   :  { %v101_v36 = vpop.permute.xlu1 %100  ;;  %v56_v37 = vpop.permute.xlu0 %55 }
  0xa9   :  { %vm108_vm0 = vcmp.eq.s32.totalorder %v101_v36, %v1401_v35  ;;  %vm109_vm1 = vcmp.eq.s32.totalorder %v101_v36, %v1404_v38  ;;  %vm63_vm2 = vcmp.eq.s32.totalorder %v56_v37, %v1401_v35  ;;  %vm110_vm3 = vcmp.eq.s32.totalorder %v101_v36, %v1407_v40 }
  0xaa   :  { %vm64_vm4 = vcmp.eq.s32.totalorder %v56_v37, %v1404_v38  ;;  %vm65_vm5 = vcmp.eq.s32.totalorder %v56_v37, %v1407_v40  ;;  %v959_v45 = vsel %vm108_vm0, 1.0, %v1319_v44  ;;  %v960_v46 = vsel %vm109_vm1, 1.0, %v1319_v44 }
  0xab   :  { %v950_v47 = vsel %vm63_vm2, 1.0, %v1319_v44  ;;  %v961_v48 = vsel %vm110_vm3, 1.0, %v1319_v44  ;;  %v951_v49 = vsel %vm64_vm4, 1.0, %v1319_v44  ;;  %v952_v50 = vsel %vm65_vm5, 1.0, %v1319_v44 }
  0xac   :  { %v104_v39 = vpop.permute.xlu1 %103  ;;  %v59_v41 = vpop.permute.xlu0 %58  ;;  %v135_v55 = vadd.f32 %v959_v45, %v950_v47  ;;  %v136_v60 = vadd.f32 %v960_v46, %v951_v49  ;;  %v137_v61 = vadd.f32 %v961_v48, %v952_v50 }
  0xad   :  { %vm111_vm6 = vcmp.eq.s32.totalorder %v104_v39, %v1401_v35  ;;  %vm112_vm7 = vcmp.eq.s32.totalorder %v104_v39, %v1404_v38  ;;  %vm66_vm8 = vcmp.eq.s32.totalorder %v59_v41, %v1401_v35  ;;  %vm67_vm9 = vcmp.eq.s32.totalorder %v59_v41, %v1404_v38 }
  0xae   :  { %vm113_vm10 = vcmp.eq.s32.totalorder %v104_v39, %v1407_v40  ;;  %vm68_vm11 = vcmp.eq.s32.totalorder %v59_v41, %v1407_v40  ;;  %v962_v51 = vsel %vm111_vm6, 1.0, %v1319_v44  ;;  %v963_v52 = vsel %vm112_vm7, 1.0, %v1319_v44 }
  0xaf   :  { %v953_v53 = vsel %vm66_vm8, 1.0, %v1319_v44  ;;  %v954_v54 = vsel %vm67_vm9, 1.0, %v1319_v44  ;;  %v964_v56 = vsel %vm113_vm10, 1.0, %v1319_v44  ;;  %v955_v57 = vsel %vm68_vm11, 1.0, %v1319_v44 }
  0xb0   :  { %v138_v62 = vadd.f32 %v962_v51, %v953_v53  ;;  %v139_v63 = vadd.f32 %v963_v52, %v954_v54  ;;  %v140_v2 = vadd.f32 %v964_v56, %v955_v57 }
  0xb1   :  { %v149_v42 = vpop.permute.xlu1 %148  ;;  %v107_v43 = vpop.permute.xlu0 %106 }
  0xb2   :  { %vm156_vm12 = vcmp.eq.s32.totalorder %v149_v42, %v1401_v35  ;;  %vm157_vm13 = vcmp.eq.s32.totalorder %v149_v42, %v1404_v38  ;;  %vm158_vm14 = vcmp.eq.s32.totalorder %v149_v42, %v1407_v40  ;;  %vm114_vm15 = vcmp.eq.s32.totalorder %v107_v43, %v1401_v35 }
  0xb3   :  { %v971_v0 = vsel %vm156_vm12, 1.0, %v1319_v44  ;;  %vm115_vm0 = vcmp.eq.s32.totalorder %v107_v43, %v1404_v38  ;;  %v972_v3 = vsel %vm157_vm13, 1.0, %v1319_v44  ;;  %v973_v4 = vsel %vm158_vm14, 1.0, %v1319_v44 }
  0xb4   :  { %vm116_vm3 = vcmp.eq.s32.totalorder %v107_v43, %v1407_v40  ;;  %v183_v6 = vadd.f32 %v971_v0, %v138_v62  ;;  %v965_v7 = vsel %vm114_vm15, 1.0, %v1319_v44  ;;  %v966_v9 = vsel %vm115_vm0, 1.0, %v1319_v44 }
  0xb5   :  { %v967_v12 = vsel %vm116_vm3, 1.0, %v1319_v44  ;;  %v184_v14 = vadd.f32 %v972_v3, %v139_v63  ;;  %v185_v15 = vadd.f32 %v973_v4, %v140_v2 }
  0xb6   :  { %v62_v58 = vpop.permute.xlu1 %61  ;;  %v146_v59 = vpop.permute.xlu0 %145 }
  0xb7   :  { %vm69_vm1 = vcmp.eq.s32.totalorder %v62_v58, %v1401_v35  ;;  %vm70_vm2 = vcmp.eq.s32.totalorder %v62_v58, %v1404_v38  ;;  %vm71_vm4 = vcmp.eq.s32.totalorder %v62_v58, %v1407_v40  ;;  %vm153_vm5 = vcmp.eq.s32.totalorder %v146_v59, %v1401_v35 }
  0xb8   :  { %vm154_vm6 = vcmp.eq.s32.totalorder %v146_v59, %v1404_v38  ;;  %v956_v10 = vsel %vm69_vm1, 1.0, %v1319_v44  ;;  %v957_v11 = vsel %vm70_vm2, 1.0, %v1319_v44  ;;  %vm155_vm7 = vcmp.eq.s32.totalorder %v146_v59, %v1407_v40 }
  0xb9   :  { %v958_v13 = vsel %vm71_vm4, 1.0, %v1319_v44  ;;  %v968_v16 = vsel %vm153_vm5, 1.0, %v1319_v44  ;;  %v969_v17 = vsel %vm154_vm6, 1.0, %v1319_v44  ;;  %v1458_v18 = vadd.f32 %v965_v7, %v956_v10 }
  0xba   :  { %v152_v5 = vpop.permute.xlu0 %151  ;;  %v142_v19 = vadd.f32 %v966_v9, %v957_v11  ;;  %v970_v20 = vsel %vm155_vm7, 1.0, %v1319_v44  ;;  %v143_v22 = vadd.f32 %v967_v12, %v958_v13  ;;  %v180_v25 = vadd.f32 %v968_v16, %v135_v55  ;;  %v1180_v11 = vld [vmem:[#allocation5] ss:$12 sps:$4 sm:$0xff]  }
  0xbb   :  { %v191_v8 = vpop.permute.xlu1 %190  ;;  %vm160_vm8 = vcmp.eq.s32.totalorder %v152_v5, %v1404_v38  ;;  %vm161_vm9 = vcmp.eq.s32.totalorder %v152_v5, %v1407_v40  ;;  %vm159_vm10 = vcmp.eq.s32.totalorder %v152_v5, %v1401_v35  ;;  %v181_v26 = vadd.f32 %v969_v17, %v136_v60 }
  0xbc   :  { %v975_v23 = vsel %vm160_vm8, 1.0, %v1319_v44  ;;  %v976_v24 = vsel %vm161_vm9, 1.0, %v1319_v44  ;;  %vm198_vm11 = vcmp.eq.s32.totalorder %v191_v8, %v1401_v35  ;;  %vm199_vm12 = vcmp.eq.s32.totalorder %v191_v8, %v1404_v38 }
  0xbd   :  { %v182_v28 = vadd.f32 %v970_v20, %v137_v61  ;;  %v974_v29 = vsel %vm159_vm10, 1.0, %v1319_v44  ;;  %v187_v30 = vadd.f32 %v975_v23, %v142_v19  ;;  %v188_v31 = vadd.f32 %v976_v24, %v143_v22  ;;  %v1190_v19 = vld [vmem:[#allocation5 + $0x20] ss:$12 sps:$4 sm:$0xff]   ;;  %v1183_v20 = vld [vmem:[#allocation5 + $0x18] ss:$12 sps:$4 sm:$0xff]  }
  0xbe   :  { %vm200_vm0 = vcmp.eq.s32.totalorder %v191_v8, %v1407_v40  ;;  %v977_v32 = vsel %vm198_vm11, 1.0, %v1319_v44  ;;  %v978_v36 = vsel %vm199_vm12, 1.0, %v1319_v44  ;;  %v186_v12 = vadd.f32 %v974_v29, %v1458_v18  ;;  %v1189_v22 = vld [vmem:[#allocation5 + $0x34] ss:$12 sps:$4 sm:$0xff]   ;;  %v1194_v18 = vld [vmem:[#allocation5 + $0x38] ss:$12 sps:$4 sm:$0xff]  }
  0xbf   :  { %v194_v21 = vpop.permute.xlu1 %193  ;;  %v197_v27 = vpop.permute.xlu0 %196  ;;  %v979_v43 = vsel %vm200_vm0, 1.0, %v1319_v44  ;;  %v225_v45 = vadd.f32 %v977_v32, %v180_v25  ;;  %v226_v49 = vadd.f32 %v978_v36, %v181_v26  ;;  %v1193_v24 = vld [vmem:[#allocation5 + $0x4c] ss:$12 sps:$4 sm:$0xff]   ;;  %v1198_v25 = vld [vmem:[#allocation5 + $0x50] ss:$12 sps:$4 sm:$0xff]  }
  0xc0   :  { %vm201_vm13 = vcmp.eq.s32.totalorder %v194_v21, %v1401_v35  ;;  %vm202_vm14 = vcmp.eq.s32.totalorder %v194_v21, %v1404_v38  ;;  %vm203_vm15 = vcmp.eq.s32.totalorder %v194_v21, %v1407_v40  ;;  %vm205_vm1 = vcmp.eq.s32.totalorder %v197_v27, %v1404_v38  ;;  %v1191_v26 = vld [vmem:[#allocation5 + $0x48] ss:$12 sps:$4 sm:$0xff]   ;;  %v1206_v36 = vld [vmem:[#allocation5 + $0x80] ss:$12 sps:$4 sm:$0xff]  }
  0xc1   :  { %v980_v37 = vsel %vm201_vm13, 1.0, %v1319_v44  ;;  %vm206_vm2 = vcmp.eq.s32.totalorder %v197_v27, %v1407_v40  ;;  %v981_v41 = vsel %vm202_vm14, 1.0, %v1319_v44  ;;  %v982_v42 = vsel %vm203_vm15, 1.0, %v1319_v44  ;;  %v1201_v29 = vld [vmem:[#allocation5 + $0x7c] ss:$12 sps:$4 sm:$0xff]  }
  0xc2   :  { %vm204_vm5 = vcmp.eq.s32.totalorder %v197_v27, %v1401_v35  ;;  %v228_v46 = vadd.f32 %v980_v37, %v183_v6  ;;  %v984_v47 = vsel %vm205_vm1, 1.0, %v1319_v44  ;;  %v985_v48 = vsel %vm206_vm2, 1.0, %v1319_v44  ;;  %v1197_v27 = vld [vmem:[#allocation5 + $0x64] ss:$12 sps:$4 sm:$0xff]   ;;  %v1205_v32 = vld [vmem:[#allocation5 + $0x94] ss:$12 sps:$4 sm:$0xff]  }
  0xc3   :  { %v229_v52 = vadd.f32 %v981_v41, %v184_v14  ;;  %v230_v54 = vadd.f32 %v982_v42, %v185_v15  ;;  %v227_v58 = vadd.f32 %v979_v43, %v182_v28  ;;  %v232_v0 = vadd.f32 %v984_v47, %v187_v30  ;;  %v1199_v28 = vld [vmem:[#allocation5 + $0x78] ss:$12 sps:$4 sm:$0xff]   ;;  %v1202_v30 = vld [vmem:[#allocation5 + $0x68] ss:$12 sps:$4 sm:$0xff]   ;;  %v1211_v42 = vld [vmem:[#allocation5 + $0xb0] ss:$12 sps:$4 sm:$0xff]  }
  0xc4   :  { %v236_v39 = vpop.permute.xlu1 %235  ;;  %v233_v2 = vadd.f32 %v985_v48, %v188_v31  ;;  %v983_v7 = vsel %vm204_vm5, 1.0, %v1319_v44  ;;  %v1203_v31 = vld [vmem:[#allocation5 + $0x90] ss:$12 sps:$4 sm:$0xff]   ;;  %v1209_v37 = vld [vmem:[#allocation5 + $0xac] ss:$12 sps:$4 sm:$0xff]  }
  0xc5   :  { %vm243_vm3 = vcmp.eq.s32.totalorder %v236_v39, %v1401_v35  ;;  %vm244_vm4 = vcmp.eq.s32.totalorder %v236_v39, %v1404_v38  ;;  %vm245_vm6 = vcmp.eq.s32.totalorder %v236_v39, %v1407_v40  ;;  %v231_v16 = vadd.f32 %v983_v7, %v186_v12  ;;  %v1207_v39 = vld [vmem:[#allocation5 + $0xa8] ss:$12 sps:$4 sm:$0xff]   ;;  %v1210_v41 = vld [vmem:[#allocation5 + $0x98] ss:$12 sps:$4 sm:$0xff]  }
  0xc6   :  { %v986_v50 = vsel %vm243_vm3, 1.0, %v1319_v44  ;;  %v987_v53 = vsel %vm244_vm4, 1.0, %v1319_v44  ;;  %v988_v55 = vsel %vm245_vm6, 1.0, %v1319_v44 }
  0xc7   :  { %v271_v61 = vadd.f32 %v987_v53, %v226_v49  ;;  %v270_v3 = vadd.f32 %v986_v50, %v225_v45  ;;  %v272_v5 = vadd.f32 %v988_v55, %v227_v58 }
  0xc8   :  { %v239_v51 = vpop.permute.xlu1 %238 }
  0xc9   :  { %vm246_vm7 = vcmp.eq.s32.totalorder %v239_v51, %v1401_v35  ;;  %vm247_vm8 = vcmp.eq.s32.totalorder %v239_v51, %v1404_v38  ;;  %vm248_vm9 = vcmp.eq.s32.totalorder %v239_v51, %v1407_v40 }
  0xca   :  { %v989_v56 = vsel %vm246_vm7, 1.0, %v1319_v44  ;;  %v990_v57 = vsel %vm247_vm8, 1.0, %v1319_v44  ;;  %v991_v59 = vsel %vm248_vm9, 1.0, %v1319_v44 }
  0xcb   :  { %v273_v60 = vadd.f32 %v989_v56, %v228_v46  ;;  %v274_v62 = vadd.f32 %v990_v57, %v229_v52  ;;  %v275_v63 = vadd.f32 %v991_v59, %v230_v54 }
  0xcc   :  { %v242_v4 = vpop.permute.xlu1 %241 }
  0xcd   :  { %vm249_vm10 = vcmp.eq.s32.totalorder %v242_v4, %v1401_v35  ;;  %vm250_vm11 = vcmp.eq.s32.totalorder %v242_v4, %v1404_v38  ;;  %vm251_vm12 = vcmp.eq.s32.totalorder %v242_v4, %v1407_v40  ;;  %v280_v6 = vpack.c.bf16 %v274_v62, %v271_v61  ;;  %v1185_v40 = vld [vmem:[#allocation5 + $0x1c] ss:$12 sps:$4 sm:$0xff]  }
  0xce   :  { %v993_v8 = vsel %vm250_vm11, 1.0, %v1319_v44  ;;  %v994_v9 = vsel %vm251_vm12, 1.0, %v1319_v44  ;;  %v281_v10 = vpack.c.bf16 %v275_v63, %v272_v5  ;;  %v279_v13 = vpack.c.bf16 %v273_v60, %v270_v3 }
  0xcf   :  { %509 = vmatprep.mubr.bf16.mxu0 %v280_v6  ;;  %v277_v14 = vadd.f32 %v993_v8, %v232_v0  ;;  %v278_v15 = vadd.f32 %v994_v9, %v233_v2  ;;  %v992_v38 = vsel %vm249_vm10, 1.0, %v1319_v44  ;;  %v1187_v44 = vld [vmem:[#allocation5 + $0x30] ss:$12 sps:$4 sm:$0xff]   ;;  %v613_v4 = vshrl.u32 %v47_v34, 7  ;;  %v610_v8 = vld [vmem:[%s1571_s3] sm:$0x7] }
  0xd0   :  { %1107 = vmatprep.mubr.bf16.mxu1 %v281_v10  ;;  %510 = vmatmul.mubr.bf16.vlgmr.msra.gmra.mrb[0].mxu0 %v279_v13  ;;  %v276_v21 = vadd.f32 %v992_v38, %v231_v16  ;;  %s1320_s3 = smov [#allocation7]  }
  0xd1   :  { %v283_v35 = vpack.c.bf16 %v277_v14, %v277_v14  ;;  %v284_v17 = vpack.c.bf16 %v278_v15, %v278_v15  ;;  %756 = vmatpush1.bf16.msra.mxu0 %v1180_v11  ;;  %v614_v5 = vsub.s32 0, %v613_v4  ;;  %v622_v7 = vsub.s32 2, %v613_v4  ;;  %s937_s22 = sshll.u32 %s1320_s3, 4  ;;  %s938_s22 = int_to_ptr.vmem [resolvable:$true] %s937_s22 }
  0xd2   :  { %757 = vmatprep.subr.bf16.mxu0 %v1185_v40  ;;  %v282_v23 = vpack.c.bf16 %v276_v21, %v276_v21  ;;  %v618_v9 = vsub.s32 1, %v613_v4  ;;  %s1280_s23 = scalar_lea.vmem %s938_s22, 1152  ;;  %p1285_p3 = scmp.lt.s32.totalorder %s938_s22, %s938_s22 }
  0xd3   :  { %517 = vmatprep.mubr.bf16.mxu0 %v283_v35  ;;  %1108 = vmatmul.mubr.bf16.vlgmr.msra.gmra.mrb[0].mxu1 %v284_v17  ;;  %v615_v13 = vrot.slane %v610_v8, %v614_v5  ;;  %v623_v14 = vrot.slane %v610_v8, %v622_v7  ;;  %p1281_p2 = scmp.ne.s32.totalorder %s938_s22, %s1280_s23  ;;  %p1286_p4 = scmp.lt.s32.totalorder %s1280_s23, %s1280_s23 }
  0xd4   :  { %1112 = vmatpush3.bf16.msra.mxu1 %v1397_v33  ;;  %v1195_v33 = vld [vmem:[#allocation5 + $0x60] ss:$12 sps:$4 sm:$0xff]  }
  0xd5   :  { %1113 = vmatprep.subr.bf16.mxu1 %v1190_v19  ;;  %758 = vmatpush1.bf16.msra.mxu0 %v1183_v20  ;;  %p1287_p5 = por %p1286_p4, %p1285_p3 }
  0xd6   :  { %759 = vmatprep.subr.bf16.mxu0 %v1189_v22 }
  0xd7   :  { %p1288_p6 = pnand %p1287_p5, %p1281_p2 }
  0xd8   :  { %1114 = vmatpush3.bf16.msra.mxu1 %v1190_v19  ;;  %518 = vmatmul.mubr.bf16.gmra.mrb[4].mxu0 %v282_v23 }
  0xd9   :  { %1115 = vmatprep.subr.bf16.mxu1 %v1194_v18  ;;  %760 = vmatpush1.bf16.msra.mxu0 %v1187_v44 }
  0xda   :  { %787 = vmatprep.mubr.bf16.mxu0 %v1315_v1  ;;  %761 = vmatprep.subr.bf16.mxu0 %v1193_v24 }
  0xdc   :  { %1116 = vmatpush3.bf16.msra.mxu1 %v1194_v18 }
  0xdd   :  { %1117 = vmatprep.subr.bf16.mxu1 %v1198_v25  ;;  %762 = vmatpush1.bf16.msra.mxu0 %v1191_v26 }
  0xde   :  { %763 = vmatprep.subr.bf16.mxu0 %v1197_v27 }
  0xe0   :  { %1118 = vmatpush3.bf16.msra.mxu1 %v1198_v25 }
  0xe1   :  { %764 = vmatpush1.bf16.msra.mxu0 %v1195_v33  ;;  %1119 = vmatprep.subr.bf16.mxu1 %v1202_v30 }
  0xe2   :  { %765 = vmatprep.subr.bf16.mxu0 %v1201_v29 }
  0xe4   :  { %1120 = vmatpush3.bf16.msra.mxu1 %v1202_v30 }
  0xe5   :  { %766 = vmatpush1.bf16.msra.mxu0 %v1199_v28  ;;  %1121 = vmatprep.subr.bf16.mxu1 %v1206_v36 }
  0xe6   :  { %767 = vmatprep.subr.bf16.mxu0 %v1205_v32 }
  0xe8   :  { %1122 = vmatpush3.bf16.msra.mxu1 %v1206_v36 }
  0xe9   :  { %768 = vmatpush1.bf16.msra.mxu0 %v1203_v31  ;;  %1123 = vmatprep.subr.bf16.mxu1 %v1210_v41 }
  0xea   :  { %769 = vmatprep.subr.bf16.mxu0 %v1209_v37 }
  0xec   :  { %1124 = vmatpush3.bf16.msra.mxu1 %v1210_v41 }
  0xed   :  { %770 = vmatpush1.bf16.msra.mxu0 %v1207_v39  ;;  %1125 = vmatprep.subr.bf16.mxu1 %v1211_v42 }
  0xf0   :  { %1126 = vmatpush3.bf16.msra.mxu1 %v1211_v42 }
 0x1a3   :  { %v1059_v43 = vpop.f32.mrb[0].mxu0 }
 0x1a4   :  { %v1060_v45 = vpop.f32.mrb[1].mxu0 }
 0x1a5   :  { %v1061_v46 = vadd.f32 %v1060_v45, %v1059_v43  ;;  %v1062_v47 = vpop.f32.mrb[2].mxu0 }
 0x1a6   :  { %v1109_v48 = vpop.f32.mrb[0].mxu1  ;;  %v1063_v49 = vpop.f32.mrb[3].mxu0 }
 0x1a7   :  { %v559_v50 = vpop.f32.mrb[1].mxu1  ;;  %v1064_v51 = vadd.f32 %v1063_v49, %v1062_v47 }
 0x1a8   :  { %v560_v52 = vadd.f32 %v1061_v46, %v559_v50  ;;  %v1110_v53 = vpop.f32.mrb[2].mxu1 }
 0x1a9   :  { %v562_v54 = vpop.f32.mrb[3].mxu1 }
 0x1aa   :  { %v563_v55 = vadd.f32 %v1064_v51, %v562_v54  ;;  %v573_v56 = vmul.f32 0.2, %v560_v52 }
 0x1ab   :  { %v1065_v58 = vpop.f32.mrb[4].mxu0 }
 0x1ac   :  { %v574_v57 = vmul.f32 0.2, %v563_v55  ;;  %v1066_v59 = vpop.f32.mrb[5].mxu0 }
 0x1ad   :  { %v1067_v61 = vadd.f32 %v1066_v59, %v1065_v58  ;;  %v1068_v62 = vpop.f32.mrb[6].mxu0 }
 0x1ae   :  { %v576_v60 = vpack.c.bf16 %v574_v57, %v573_v56  ;;  %v1069_v63 = vpop.f32.mrb[7].mxu0 }
 0x1af   :  { %v568_v0 = vadd.f32 %v1109_v48, %v1067_v61 }
 0x1b0   :  { %788 = vmatmul.mubr.bf16.vlgmr.msra.gmra.mrb[8].mxu0 %v576_v60  ;;  %1127 = vmatprep.mubr.bf16.mxu1 %v576_v60 }
 0x1b1   :  { %797 = vmatprep.mubr.bf16.mxu0 %v1315_v1  ;;  %v575_v2 = vmul.f32 0.2, %v568_v0  ;;  %v619_v1 = vrot.slane %v610_v8, %v618_v9 }
 0x1b3   :  { %v577_v3 = vpack.c.bf16 %v575_v2, %v575_v2 }
 0x1b5   :  { %1128 = vmatmul.mubr.bf16.vlgmr.msra.gmra.mrb[4].mxu1 %v577_v3 }
 0x1b8   :  { %798 = vmatmul.mubr.bf16.gmra.mrb[12].mxu0 %v577_v3 }
 0x283   :  { %v789_v6 = vpop.f32.mrb[8].mxu0 }
 0x284   :  { %v791_v10 = vpop.f32.mrb[9].mxu0  ;;  %v1511_v40 = vadd.f32 %v789_v6, %v615_v13 }
 0x285   :  { %v793_v11 = vpop.f32.mrb[10].mxu0  ;;  %v1515_v17 = vadd.f32 %v791_v10, %v619_v1 }
 0x286   :  { %v795_v12 = vpop.f32.mrb[11].mxu0  ;;  %v1517_v21 = vadd.f32 %v793_v11, %v615_v13 }
 0x287   :  { %v1525_v25 = vadd.f32 %v795_v12, %v619_v1 }
 0x288   :  { %v1129_v15 = vpop.f32.mrb[4].mxu1 }
 0x289   :  { %v840_v38 = vpop.f32.mrb[5].mxu1  ;;  %v1527_v26 = vadd.f32 %v1129_v15, %v623_v14 }
 0x28a   :  { %v1513_v16 = vadd.f32 %v840_v38, %v623_v14  ;;  %v1130_v34 = vpop.f32.mrb[6].mxu1 }
 0x28b   :  { %v799_v35 = vpop.f32.mrb[12].mxu0  ;;  %v843_v19 = vpop.f32.mrb[7].mxu1 }
 0x28c   :  { %v801_v20 = vpop.f32.mrb[13].mxu0  ;;  %v1519_v22 = vadd.f32 %v799_v35, %v615_v13  ;;  %v1521_v18 = vadd.f32 %v843_v19, %v623_v14  ;;  %v854_v23 = vmax.f32 %v1511_v40, %v1513_v16 }
 0x28d   :  { %v803_v44 = vpop.f32.mrb[14].mxu0  ;;  %v1532_v28 = vadd.f32 %v801_v20, %v619_v1 }
 0x28e   :  { %v804_v24 = vpop.f32.mrb[15].mxu0  ;;  %v855_v27 = vmax.f32 %v854_v23, %v1515_v17  ;;  %v858_v33 = vmax.f32 %v1517_v21, %v1521_v18  ;;  %v862_v30 = vmax.f32 %v1519_v22, %v1527_v26 }
 0x290   :  { %856 = vmax.xlane.f32.xlu1 %v855_v27  ;;  %v859_v29 = vmax.f32 %v858_v33, %v1525_v25  ;;  %v863_v31 = vmax.f32 %v862_v30, %v1532_v28 }
 0x292   :  { %860 = vmax.xlane.f32.xlu0 %v859_v29 }
 0x296   :  { %864 = vmax.xlane.f32.xlu0 %v863_v31 }
 0x31d   :  { %v857_v32 = vpop.xlane.xlu1 %856 }
 0x31e   :  { %v866_v36 = vsub.f32 %v1511_v40, %v857_v32  ;;  %v867_v37 = vsub.f32 %v1515_v17, %v857_v32  ;;  %v868_v39 = vsub.f32 %v1513_v16, %v857_v32 }
 0x31f   :  { %v861_v41 = vpop.xlane.xlu0 %860 }
 0x320   :  { %v875_v42 = vmul.f32 1.442695, %v866_v36  ;;  %v877_v43 = vmul.f32 1.442695, %v867_v37  ;;  %v879_v45 = vmul.f32 1.442695, %v868_v39  ;;  %v869_v46 = vsub.f32 %v1517_v21, %v861_v41 }
 0x321   :  { %v870_v47 = vsub.f32 %v1525_v25, %v861_v41  ;;  %v871_v48 = vsub.f32 %v1521_v18, %v861_v41 }
 0x322   :  { %1212 = vpow2.f32 %v875_v42  ;;  %v881_v49 = vmul.f32 1.442695, %v869_v46 }
 0x323   :  { %1214 = vpow2.f32 %v877_v43  ;;  %v883_v50 = vmul.f32 1.442695, %v870_v47  ;;  %v885_v51 = vmul.f32 1.442695, %v871_v48  ;;  %v865_v52 = vpop.xlane.xlu0 %864 }
 0x324   :  { %1216 = vpow2.f32 %v879_v45  ;;  %v872_v53 = vsub.f32 %v1519_v22, %v865_v52  ;;  %v873_v54 = vsub.f32 %v1532_v28, %v865_v52  ;;  %v874_v55 = vsub.f32 %v1527_v26, %v865_v52 }
 0x325   :  { %1218 = vpow2.f32 %v881_v49 }
 0x326   :  { %1220 = vpow2.f32 %v883_v50  ;;  %v887_v56 = vmul.f32 1.442695, %v872_v53  ;;  %v889_v57 = vmul.f32 1.442695, %v873_v54  ;;  %v891_v58 = vmul.f32 1.442695, %v874_v55 }
 0x327   :  { %1222 = vpow2.f32 %v885_v51 }
 0x328   :  { %1224 = vpow2.f32 %v887_v56 }
 0x329   :  { %1226 = vpow2.f32 %v889_v57 }
 0x32a   :  { %1228 = vpow2.f32 %v891_v58 }
 0x32c   :  { %v1213_v59 = vpop.eup %1212 }
 0x32d   :  { %v1215_v60 = vpop.eup %1214 }
 0x32e   :  { %v1217_v61 = vpop.eup %1216  ;;  %v893_v62 = vadd.f32 %v1215_v60, %v1213_v59 }
 0x32f   :  { %v1219_v63 = vpop.eup %1218 }
 0x330   :  { %v1221_v0 = vpop.eup %1220  ;;  %v894_v2 = vadd.f32 %v1217_v61, %v893_v62 }
 0x331   :  { %v1223_v3 = vpop.eup %1222  ;;  %v897_v4 = vadd.f32 %v1221_v0, %v1219_v63 }
 0x332   :  { %v1225_v5 = vpop.eup %1224  ;;  %895 = vadd.xlane.f32.xlu1 %v894_v2 }
 0x333   :  { %v1227_v6 = vpop.eup %1226  ;;  %v898_v7 = vadd.f32 %v1223_v3, %v897_v4 }
 0x334   :  { %v901_v8 = vadd.f32 %v1227_v6, %v1225_v5  ;;  %v1229_v9 = vpop.eup %1228 }
 0x335   :  { %899 = vadd.xlane.f32.xlu0 %v898_v7 }
 0x336   :  { %v902_v10 = vadd.f32 %v1229_v9, %v901_v8 }
 0x338   :  { %903 = vadd.xlane.f32.xlu1 %v902_v10 }
 0x3bf   :  { %v896_v11 = vpop.xlane.xlu1 %895 }
 0x3c0   :  { %1230 = vlog2.f32 %v896_v11 }
 0x3c2   :  { %v900_v12 = vpop.xlane.xlu0 %899 }
 0x3c3   :  { %1232 = vlog2.f32 %v900_v12 }
 0x3c5   :  { %v904_v13 = vpop.xlane.xlu1 %903 }
 0x3c6   :  { %1234 = vlog2.f32 %v904_v13 }
 0x3ca   :  { %v1231_v14 = vpop.eup %1230 }
 0x3cb   :  { %v906_v1 = vmul.f32 0.6931472, %v1231_v14 }
 0x3cd   :  { %v1233_v15 = vpop.eup %1232  ;;  %v911_v38 = vadd.f32 %v906_v1, %v857_v32 }
 0x3ce   :  { %v908_v34 = vmul.f32 0.6931472, %v1233_v15 }
 0x3cf   :  { %v914_v35 = vsub.f32 %v1511_v40, %v911_v38  ;;  %v915_v19 = vsub.f32 %v1515_v17, %v911_v38  ;;  %v916_v20 = vsub.f32 %v1513_v16, %v911_v38 }
 0x3d0   :  { %v1235_v44 = vpop.eup %1234  ;;  %v912_v23 = vadd.f32 %v908_v34, %v861_v41 }
 0x3d1   :  { %923 = vst [vmem:[#allocation7] sm:$0xff] %v914_v35  ;;  %924 = vst [vmem:[#allocation7 + $0x8] sm:$0xff] %v915_v19  ;;  %v910_v24 = vmul.f32 0.6931472, %v1235_v44 }
 0x3d2   :  { %925 = vst [vmem:[#allocation7 + $0x10] sm:$0xff] %v916_v20  ;;  %v917_v27 = vsub.f32 %v1517_v21, %v912_v23  ;;  %v918_v33 = vsub.f32 %v1525_v25, %v912_v23  ;;  %v919_v29 = vsub.f32 %v1521_v18, %v912_v23 }
 0x3d3   :  { %v913_v30 = vadd.f32 %v910_v24, %v865_v52 }
 0x3d4   :  { %926 = vst [vmem:[#allocation7 + $0x18] sm:$0xff] %v917_v27  ;;  %927 = vst [vmem:[#allocation7 + $0x20] sm:$0xff] %v918_v33 }
 0x3d5   :  { %928 = vst [vmem:[#allocation7 + $0x28] sm:$0xff] %v919_v29  ;;  %v920_v40 = vsub.f32 %v1519_v22, %v913_v30  ;;  %v921_v16 = vsub.f32 %v1532_v28, %v913_v30  ;;  %v922_v17 = vsub.f32 %v1527_v26, %v913_v30 }
 0x3d7   :  { %929 = vst [vmem:[#allocation7 + $0x30] sm:$0xff] %v920_v40  ;;  %930 = vst [vmem:[#allocation7 + $0x38] sm:$0xff] %v921_v16 }
 0x3d8   :  { %931 = vst [vmem:[#allocation7 + $0x40] sm:$0xff] %v922_v17 }
 0x3d9   :  { %1291 = shalt.err (!%p1288_p6)
}
 0x3da   :  { %s1292_s26 = scalar_lea.hbm %s1572_s4, 1152 }
 0x3db   :  { %p1293_p7 = scmp.ne.s32.totalorder %s1572_s4, %s1292_s26  ;;  %p1296_p8 = scmp.lt.u32.totalorder %s1292_s26, %s1572_s4 }
 0x3dd   :  { %p1298_p9 = pnand %p1296_p8, %p1293_p7 }
 0x3df   :  { %1301 = shalt.err (!%p1298_p9)
}
 0x3e0   :  { %s1321_s5 = smov 384   ;;  %s1322_s6 = smov 24  }
 0x3e1   :  { %943 = dma.vmem_to_hbm [thread:$0]  %s938_s22, 1152, %s1572_s4, [#allocation4], %s1321_s5, %s1321_s5, %s1322_s6  }
 0x3e2   :  { %1306 = dma.done.wait [#allocation4], 1152  }
 0x3e3   :  { %1307 = vsyncadd [#allocation4], 4294966144 }
 0x3e4   :  { %947 = vsyncpa [#allocation3], 1 }
 0x3e5   :  { %948 = vsyncpa [#allocation6], 1 }
 0x3e6   :  { %949 = vsyncpa [#allocation4], 1 }

</bundles_post_ra>
